<compile_context>
chip_gen: v5e
topology: v5e:2x2
jax: 0.10.0
libtpu: 0.0.40
codegen_flags: <defaults>
</compile_context>

<pallas_src>
import jax
import jax.numpy as jnp
from jax.experimental import pallas as pl
from jax.experimental.pallas import tpu as pltpu


def _round_up(x, m):
    return (x + m - 1) // m * m


def ffn_kernel(x_ref, w1_ref, b1_ref, w2_ref, b2_ref, o_ref, acc_ref):
    # x_ref  : (tm, d_model_p)     row tile
    # w1_ref : (d_model_p, tff)    W1 column tile (kff-th)
    # b1_ref : (1, tff)
    # w2_ref : (tff, d_model_p)    W2 row tile (kff-th)
    # b2_ref : (1, d_model_p)
    # o_ref  : (tm, d_model_p)
    # acc_ref: (tm, d_model_p)     f32 accumulator scratch
    k = pl.program_id(1)

    @pl.when(k == 0)
    def _init():
        acc_ref[...] = jnp.zeros_like(acc_ref)

    # h_tile = relu(x @ W1[:, kff] + b1[kff]), computed in f32.
    h = jnp.dot(x_ref[...], w1_ref[...], preferred_element_type=jnp.float32)
    h = jnp.maximum(h + b1_ref[...].astype(jnp.float32), 0.0)
    # dropout (eval mode) == identity
    acc_ref[...] += jnp.dot(
        h.astype(w2_ref.dtype), w2_ref[...], preferred_element_type=jnp.float32
    )

    @pl.when(k == pl.num_programs(1) - 1)
    def _store():
        o_ref[...] = (
            acc_ref[...] + b2_ref[...].astype(jnp.float32)
        ).astype(o_ref.dtype)


def positionwise_feed_forward(x, w1, b1, w2, b2, *, tm=256, tff=512):
    """x: (..., d_model); w1: (d_model, d_ff); w2: (d_ff, d_model)."""
    orig_shape = x.shape
    d_model = orig_shape[-1]
    d_ff = w1.shape[1]
    x2d = x.reshape(-1, d_model)
    n_rows = x2d.shape[0]

    # Padded / tile sizes: lane-dense (128) feature dims, 8-aligned row tiles.
    d_model_p = _round_up(d_model, 128)
    d_ff_p = _round_up(d_ff, 128)
    tm = _round_up(min(tm, _round_up(n_rows, 8)), 8)
    tff = min(_round_up(tff, 128), d_ff_p)
    n_rows_p = _round_up(n_rows, tm)

    def pad2(a, r, c):
        return jnp.pad(a, ((0, r - a.shape[0]), (0, c - a.shape[1])))

    x_p = pad2(x2d, n_rows_p, d_model_p)
    w1_p = pad2(w1, d_model_p, d_ff_p)
    w2_p = pad2(w2, d_ff_p, d_model_p)
    b1_p = pad2(b1.reshape(1, d_ff), 1, d_ff_p)
    b2_p = pad2(b2.reshape(1, d_model), 1, d_model_p)

    grid = (n_rows_p // tm, d_ff_p // tff)

    itemsize = jnp.dtype(x.dtype).itemsize
    cost = pl.CostEstimate(
        flops=2 * 2 * n_rows * d_model * d_ff,
        transcendentals=0,
        bytes_accessed=itemsize
        * (x2d.size + w1.size + b1.size + w2.size + b2.size + n_rows * d_model),
    )

    out = pl.pallas_call(
        ffn_kernel,
        out_shape=jax.ShapeDtypeStruct((n_rows_p, d_model_p), x.dtype),
        grid_spec=pltpu.PrefetchScalarGridSpec(
            num_scalar_prefetch=0,
            grid=grid,
            in_specs=[
                pl.BlockSpec((tm, d_model_p), lambda i, k: (i, 0)),    # x rows
                pl.BlockSpec((d_model_p, tff), lambda i, k: (0, k)),   # W1 cols
                pl.BlockSpec((1, tff), lambda i, k: (0, k)),           # b1
                pl.BlockSpec((tff, d_model_p), lambda i, k: (k, 0)),   # W2 rows
                pl.BlockSpec((1, d_model_p), lambda i, k: (0, 0)),     # b2
            ],
            out_specs=pl.BlockSpec((tm, d_model_p), lambda i, k: (i, 0)),
            scratch_shapes=[pltpu.VMEM((tm, d_model_p), jnp.float32)],
        ),
        compiler_params=pltpu.CompilerParams(
            dimension_semantics=("parallel", "arbitrary"),
            vmem_limit_bytes=56 * 1024 * 1024,
        ),
        cost_estimate=cost,
    )(x_p, w1_p, b1_p, w2_p, b2_p)

    return out[:n_rows, :d_model].reshape(orig_shape)


def init_params(key, d_model, d_ff, dtype=jnp.float32):
    """Deterministic init mimicking nn.Linear defaults (uniform +/- 1/sqrt(fan_in))."""
    k1, k2, k3, k4 = jax.random.split(key, 4)
    lim1 = 1.0 / (d_model ** 0.5)
    lim2 = 1.0 / (d_ff ** 0.5)
    # Stored as (in, out) == transpose of PyTorch's (out, in) weight.
    w1 = jax.random.uniform(k1, (d_model, d_ff), dtype, -lim1, lim1)
    b1 = jax.random.uniform(k2, (d_ff,), dtype, -lim1, lim1)
    w2 = jax.random.uniform(k3, (d_ff, d_model), dtype, -lim2, lim2)
    b2 = jax.random.uniform(k4, (d_model,), dtype, -lim2, lim2)
    return w1, b1, w2, b2


if __name__ == "__main__":
    batch, seq, d_model, d_ff = 2, 8, 32, 128

    key = jax.random.PRNGKey(0)
    kx, kp = jax.random.split(key)
    x = jax.random.normal(kx, (batch, seq, d_model), dtype=jnp.float32)
    w1, b1, w2, b2 = init_params(kp, d_model, d_ff)

    y = positionwise_feed_forward(x, w1, b1, w2, b2)
    y = jax.block_until_ready(y)

    # Pure-JAX reference check
    h_ref = jnp.maximum(x @ w1 + b1, 0.0)
    y_ref = h_ref @ w2 + b2
    assert y.shape == x.shape
    assert jnp.allclose(y, y_ref, atol=1e-5, rtol=1e-5)

    print("KERNEL_OK")
</pallas_src>

<mosaic_0001>
module attributes {stable_mosaic.version = 11 : i64} {
  func.func @ffn_kernel(%arg0: i32, %arg1: i32, %arg2: memref<16x128xf32, #tpu.memory_space<vmem>>, %arg3: memref<128x128xf32, #tpu.memory_space<vmem>>, %arg4: memref<1x128xf32, #tpu.memory_space<vmem>>, %arg5: memref<128x128xf32, #tpu.memory_space<vmem>>, %arg6: memref<1x128xf32, #tpu.memory_space<vmem>>, %arg7: memref<16x128xf32, #tpu.memory_space<vmem>>, %arg8: memref<16x128xf32, #tpu.memory_space<vmem>>) attributes {dimension_semantics = [#tpu.dimension_semantics<parallel>, #tpu.dimension_semantics<arbitrary>], iteration_bounds = array<i64: 1, 1>, scalar_prefetch = 0 : i64, scratch_operands = 1 : i64, tpu.core_type = #tpu.core_type<tc>, window_params = [{transform_indices = @transform_0, window_bounds = array<i64: 16, 128>}, {transform_indices = @transform_1, window_bounds = array<i64: 128, 128>}, {transform_indices = @transform_2, window_bounds = array<i64: 1, 128>}, {transform_indices = @transform_3, window_bounds = array<i64: 128, 128>}, {pipeline_mode = #tpu.pipeline_mode<synchronous>, transform_indices = @transform_4, window_bounds = array<i64: 1, 128>}, {transform_indices = @transform_5, window_bounds = array<i64: 16, 128>}]} {
    %c0_i32 = arith.constant 0 : i32
    %0 = arith.cmpi eq, %arg1, %c0_i32 : i32
    %1 = arith.extui %0 : i1 to i32
    %c0_i32_0 = arith.constant 0 : i32
    %2 = arith.cmpi ne, %1, %c0_i32_0 : i32
    scf.if %2 {
      %cst_16 = arith.constant 0.000000e+00 : f32
      %19 = vector.broadcast %cst_16 : f32 to vector<16x128xf32>
      %c0_17 = arith.constant 0 : index
      %c0_18 = arith.constant 0 : index
      %20 = vector.load %arg8[%c0_17, %c0_18] : memref<16x128xf32, #tpu.memory_space<vmem>>, vector<16x128xf32>
      tpu.vector_store %arg8[%c0_17, %c0_18], %19 {strides = array<i32>} : memref<16x128xf32, #tpu.memory_space<vmem>>, vector<16x128xf32>,
    } else {
    }
    %c0 = arith.constant 0 : index
    %c0_1 = arith.constant 0 : index
    %3 = vector.load %arg2[%c0, %c0_1] : memref<16x128xf32, #tpu.memory_space<vmem>>, vector<16x128xf32>
    %c0_2 = arith.constant 0 : index
    %c0_3 = arith.constant 0 : index
    %4 = vector.load %arg3[%c0_2, %c0_3] : memref<128x128xf32, #tpu.memory_space<vmem>>, vector<128x128xf32>
    %cst = arith.constant dense<0.000000e+00> : vector<16x128xf32>
    %5 = tpu.matmul %3, %4, %cst {dimension_numbers = #tpu.dot_dimension_numbers<[1], [0], [0], [1], [0, 0, 1, 1], [], []>} : vector<16x128xf32>, vector<128x128xf32>, vector<16x128xf32> -> vector<16x128xf32>
    %c0_4 = arith.constant 0 : index
    %c0_5 = arith.constant 0 : index
    %6 = vector.load %arg4[%c0_4, %c0_5] : memref<1x128xf32, #tpu.memory_space<vmem>>, vector<1x128xf32>
    %7 = vector.broadcast %6 : vector<1x128xf32> to vector<16x128xf32>
    %8 = arith.addf %5, %7 : vector<16x128xf32>
    %cst_6 = arith.constant 0.000000e+00 : f32
    %9 = vector.broadcast %cst_6 : f32 to vector<16x128xf32>
    %10 = arith.maximumf %8, %9 : vector<16x128xf32>
    %c0_7 = arith.constant 0 : index
    %c0_8 = arith.constant 0 : index
    %11 = vector.load %arg8[%c0_7, %c0_8] : memref<16x128xf32, #tpu.memory_space<vmem>>, vector<16x128xf32>
    %c0_9 = arith.constant 0 : index
    %c0_10 = arith.constant 0 : index
    %12 = vector.load %arg5[%c0_9, %c0_10] : memref<128x128xf32, #tpu.memory_space<vmem>>, vector<128x128xf32>
    %cst_11 = arith.constant dense<0.000000e+00> : vector<16x128xf32>
    %13 = tpu.matmul %10, %12, %cst_11 {dimension_numbers = #tpu.dot_dimension_numbers<[1], [0], [0], [1], [0, 0, 1, 1], [], []>} : vector<16x128xf32>, vector<128x128xf32>, vector<16x128xf32> -> vector<16x128xf32>
    %14 = arith.addf %11, %13 : vector<16x128xf32>
    %c0_12 = arith.constant 0 : index
    %c0_13 = arith.constant 0 : index
    %15 = vector.load %arg8[%c0_12, %c0_13] : memref<16x128xf32, #tpu.memory_space<vmem>>, vector<16x128xf32>
    tpu.vector_store %arg8[%c0_12, %c0_13], %14 {strides = array<i32>} : memref<16x128xf32, #tpu.memory_space<vmem>>, vector<16x128xf32>,
    %c0_i32_14 = arith.constant 0 : i32
    %16 = arith.cmpi eq, %arg1, %c0_i32_14 : i32
    %17 = arith.extui %16 : i1 to i32
    %c0_i32_15 = arith.constant 0 : i32
    %18 = arith.cmpi ne, %17, %c0_i32_15 : i32
    scf.if %18 {
      %c0_16 = arith.constant 0 : index
      %c0_17 = arith.constant 0 : index
      %19 = vector.load %arg8[%c0_16, %c0_17] : memref<16x128xf32, #tpu.memory_space<vmem>>, vector<16x128xf32>
      %c0_18 = arith.constant 0 : index
      %c0_19 = arith.constant 0 : index
      %20 = vector.load %arg6[%c0_18, %c0_19] : memref<1x128xf32, #tpu.memory_space<vmem>>, vector<1x128xf32>
      %21 = vector.broadcast %20 : vector<1x128xf32> to vector<16x128xf32>
      %22 = arith.addf %19, %21 : vector<16x128xf32>
      %c0_20 = arith.constant 0 : index
      %c0_21 = arith.constant 0 : index
      %23 = vector.load %arg7[%c0_20, %c0_21] : memref<16x128xf32, #tpu.memory_space<vmem>>, vector<16x128xf32>
      tpu.vector_store %arg7[%c0_20, %c0_21], %22 {strides = array<i32>} : memref<16x128xf32, #tpu.memory_space<vmem>>, vector<16x128xf32>,
    } else {
    }
    return
  }
  func.func @transform_0(%arg0: i32, %arg1: i32) -> (i32, i32) {
    %c0_i32 = arith.constant 0 : i32
    %c0_i32_0 = arith.constant 0 : i32
    return %arg0, %c0_i32 : i32, i32
  }
  func.func @transform_1(%arg0: i32, %arg1: i32) -> (i32, i32) {
    %c0_i32 = arith.constant 0 : i32
    %c0_i32_0 = arith.constant 0 : i32
    return %c0_i32, %arg1 : i32, i32
  }
  func.func @transform_2(%arg0: i32, %arg1: i32) -> (i32, i32) {
    %c0_i32 = arith.constant 0 : i32
    %c0_i32_0 = arith.constant 0 : i32
    return %c0_i32, %arg1 : i32, i32
  }
  func.func @transform_3(%arg0: i32, %arg1: i32) -> (i32, i32) {
    %c0_i32 = arith.constant 0 : i32
    %c0_i32_0 = arith.constant 0 : i32
    return %arg1, %c0_i32 : i32, i32
  }
  func.func @transform_4(%arg0: i32, %arg1: i32) -> (i32, i32) {
    %c0_i32 = arith.constant 0 : i32
    %c0_i32_0 = arith.constant 0 : i32
    %c0_i32_1 = arith.constant 0 : i32
    return %c0_i32, %c0_i32_0 : i32, i32
  }
  func.func @transform_5(%arg0: i32, %arg1: i32) -> (i32, i32) {
    %c0_i32 = arith.constant 0 : i32
    %c0_i32_0 = arith.constant 0 : i32
    return %arg0, %c0_i32 : i32, i32
  }
}

</mosaic_0001>

<bundles_post_ra>
// kernel: tpu_custom_call.1
= control target key start
LH: loop header
LB: loop body
LE: loop exit
PB: predicated region body
PF: predicated region fallthrough
CT: control target
= control target key end

     0   :  { %10 = vsyncpa [#allocation4], 0  ;;  %s407_s0 = inlined_call_operand.hbm [shape: f32[16,128], index: 0, kind: input, shape index: {}]   ;;  %s408_s1 = inlined_call_operand.hbm [shape: f32[128,128], index: 1, kind: input, shape index: {}]   ;;  %s409_s2 = inlined_call_operand.vmem [shape: f32[1,128], index: 2, kind: input, shape index: {}]   ;;  %s410_s3 = inlined_call_operand.hbm [shape: f32[128,128], index: 3, kind: input, shape index: {}]   ;;  %s411_s4 = inlined_call_operand.vmem [shape: f32[1,128], index: 4, kind: input, shape index: {}]   ;;  %s412_s5 = inlined_call_operand.hbm [shape: f32[16,128], index: 5, kind: output, shape index: {}]  }
   0x1   :  { %11 = vsyncpa [#allocation7], 0 }
   0x2   :  { %12 = vsyncpa [#allocation5], 0  ;;  %s30_s20 = sshll.u32 %s408_s1, 4  ;;  %s341_s21 = smov [#allocation6]   ;;  %s31_s20 = int_to_ptr.hbm [resolvable:$true] %s30_s20 }
   0x3   :  { %s32_s22 = sshll.u32 %s341_s21, 4  ;;  %s17_s25 = sshll.u32 %s407_s0, 4  ;;  %s33_s22 = int_to_ptr.vmem [resolvable:$true] %s32_s22  ;;  %s18_s25 = int_to_ptr.hbm [resolvable:$true] %s17_s25 }
   0x4   :  { %s342_s26 = smov 128   ;;  %s343_s27 = smov 8  }
   0x5   :  { %38 = dma.hbm_to_vmem [thread:$0]  %s31_s20, 2048, %s33_s22, [#allocation7], %s342_s26, %s342_s26, %s343_s27  }
   0x6   :  { %s344_s28 = smov [#allocation3]   ;;  %s45_s1 = sshll.u32 %s410_s3, 4  ;;  %s46_s1 = int_to_ptr.hbm [resolvable:$true] %s45_s1 }
   0x7   :  { %s19_s29 = sshll.u32 %s344_s28, 4  ;;  %s345_s0 = smov [#allocation8]   ;;  %s20_s29 = int_to_ptr.vmem [resolvable:$true] %s19_s29 }
   0x8   :  { %25 = dma.hbm_to_vmem [thread:$0]  %s18_s25, 256, %s20_s29, [#allocation4], %s342_s26, %s342_s26, %s343_s27  }
   0x9   :  { %s47_s7 = sshll.u32 %s345_s0, 4  ;;  %s48_s7 = int_to_ptr.vmem [resolvable:$true] %s47_s7 }
   0xa   :  { %53 = dma.hbm_to_vmem [thread:$0]  %s46_s1, 2048, %s48_s7, [#allocation7], %s342_s26, %s342_s26, %s343_s27  }
   0xb   :  { %335 = dma.done.wait [#allocation4], 256  }
   0xc   :  { %336 = vsyncadd [#allocation4], 4294967040 }
   0xd   :  { %337 = dma.done.wait [#allocation7], 4096  }
   0xe   :  { %338 = vsyncadd [#allocation7], 4294963200  ;;  %v91_v0 = vld [vmem:[#allocation6 + $0x78] sm:$0xff]  ;;  %v90_v1 = vld [vmem:[#allocation6 + $0x70] sm:$0xff]  ;;  %s346_s11 = smov [#allocation9]  }
   0xf   :  { %199 = vmatpush.msra.mxu2 %v91_v0  ;;  %96 = vmatpush.msra.mxu0 %v91_v0  ;;  %v89_v2 = vld [vmem:[#allocation6 + $0x68] sm:$0xff]  ;;  %v88_v3 = vld [vmem:[#allocation6 + $0x60] sm:$0xff]  ;;  %v87_v4 = vld [vmem:[#allocation6 + $0x58] sm:$0xff]  ;;  %s183_s12 = sshll.u32 %s346_s11, 4  ;;  %s184_s12 = int_to_ptr.vmem [resolvable:$true] %s183_s12 }
  0x10   :  { %v138_v5 = vld [vmem:[#allocation8 + $0x78] sm:$0xff]  ;;  %v137_v6 = vld [vmem:[#allocation8 + $0x70] sm:$0xff]  ;;  %v136_v8 = vld [vmem:[#allocation8 + $0x68] sm:$0xff] }
  0x11   :  { %200 = vmatpush.msra.mxu2 %v90_v1  ;;  %97 = vmatpush.msra.mxu0 %v90_v1  ;;  %v86_v7 = vld [vmem:[#allocation6 + $0x50] sm:$0xff]  ;;  %v85_v9 = vld [vmem:[#allocation6 + $0x48] sm:$0xff]  ;;  %v135_v10 = vld [vmem:[#allocation8 + $0x60] sm:$0xff] }
  0x12   :  { %215 = vmatpush.msra.mxu3 %v138_v5  ;;  %139 = vmatpush.msra.mxu1 %v138_v5  ;;  %v84_v11 = vld [vmem:[#allocation6 + $0x40] sm:$0xff]  ;;  %v134_v12 = vld [vmem:[#allocation8 + $0x58] sm:$0xff]  ;;  %v133_v14 = vld [vmem:[#allocation8 + $0x50] sm:$0xff] }
  0x13   :  { %201 = vmatpush.msra.mxu2 %v89_v2  ;;  %98 = vmatpush.msra.mxu0 %v89_v2  ;;  %v83_v13 = vld [vmem:[#allocation6 + $0x38] sm:$0xff]  ;;  %v82_v15 = vld [vmem:[#allocation6 + $0x30] sm:$0xff]  ;;  %v132_v16 = vld [vmem:[#allocation8 + $0x48] sm:$0xff] }
  0x14   :  { %216 = vmatpush.msra.mxu3 %v137_v6  ;;  %140 = vmatpush.msra.mxu1 %v137_v6  ;;  %v81_v17 = vld [vmem:[#allocation6 + $0x28] sm:$0xff]  ;;  %v131_v18 = vld [vmem:[#allocation8 + $0x40] sm:$0xff]  ;;  %v130_v20 = vld [vmem:[#allocation8 + $0x38] sm:$0xff] }
  0x15   :  { %202 = vmatpush.msra.mxu2 %v88_v3  ;;  %99 = vmatpush.msra.mxu0 %v88_v3  ;;  %v80_v19 = vld [vmem:[#allocation6 + $0x20] sm:$0xff]  ;;  %v79_v21 = vld [vmem:[#allocation6 + $0x18] sm:$0xff]  ;;  %v129_v22 = vld [vmem:[#allocation8 + $0x30] sm:$0xff] }
  0x16   :  { %217 = vmatpush.msra.mxu3 %v136_v8  ;;  %141 = vmatpush.msra.mxu1 %v136_v8  ;;  %v78_v23 = vld [vmem:[#allocation6 + $0x10] sm:$0xff]  ;;  %v128_v24 = vld [vmem:[#allocation8 + $0x28] sm:$0xff]  ;;  %v127_v26 = vld [vmem:[#allocation8 + $0x20] sm:$0xff] }
  0x17   :  { %203 = vmatpush.msra.mxu2 %v87_v4  ;;  %100 = vmatpush.msra.mxu0 %v87_v4  ;;  %v77_v25 = vld [vmem:[#allocation6 + $0x8] sm:$0xff]  ;;  %v76_v27 = vld [vmem:[#allocation6] sm:$0xff]  ;;  %v75_v28 = vld [vmem:[#allocation3 + $0x8] sm:$0xff] }
  0x18   :  { %218 = vmatpush.msra.mxu3 %v135_v10  ;;  %142 = vmatpush.msra.mxu1 %v135_v10  ;;  %v74_v29 = vld [vmem:[#allocation3] sm:$0xff]  ;;  %v126_v30 = vld [vmem:[#allocation8 + $0x18] sm:$0xff]  ;;  %v124_v32 = vld [vmem:[#allocation8 + $0x8] sm:$0xff] }
  0x19   :  { %204 = vmatpush.msra.mxu2 %v86_v7  ;;  %101 = vmatpush.msra.mxu0 %v86_v7  ;;  %v125_v31 = vld [vmem:[#allocation8 + $0x10] sm:$0xff]  ;;  %v123_v33 = vld [vmem:[#allocation8] sm:$0xff] }
  0x1a   :  { %219 = vmatpush.msra.mxu3 %v134_v12  ;;  %143 = vmatpush.msra.mxu1 %v134_v12  ;;  %v237_v34 = vld [vmem:[%s409_s2] ss:$0 sm:$0xff]  ;;  %s185_s2 = sshll.u32 %s412_s5, 4  ;;  %s186_s2 = int_to_ptr.hbm [resolvable:$true] %s185_s2 }
  0x1b   :  { %205 = vmatpush.msra.mxu2 %v85_v9  ;;  %102 = vmatpush.msra.mxu0 %v85_v9  ;;  %v238_v41 = vld [vmem:[%s411_s4] ss:$0 sm:$0xff] }
  0x1c   :  { %220 = vmatpush.msra.mxu3 %v133_v14  ;;  %144 = vmatpush.msra.mxu1 %v133_v14 }
  0x1d   :  { %206 = vmatpush.msra.mxu2 %v84_v11  ;;  %103 = vmatpush.msra.mxu0 %v84_v11 }
  0x1e   :  { %221 = vmatpush.msra.mxu3 %v132_v16  ;;  %145 = vmatpush.msra.mxu1 %v132_v16 }
  0x1f   :  { %207 = vmatpush.msra.mxu2 %v83_v13  ;;  %104 = vmatpush.msra.mxu0 %v83_v13 }
  0x20   :  { %222 = vmatpush.msra.mxu3 %v131_v18  ;;  %146 = vmatpush.msra.mxu1 %v131_v18 }
  0x21   :  { %208 = vmatpush.msra.mxu2 %v82_v15  ;;  %105 = vmatpush.msra.mxu0 %v82_v15 }
  0x22   :  { %223 = vmatpush.msra.mxu3 %v130_v20  ;;  %147 = vmatpush.msra.mxu1 %v130_v20 }
  0x23   :  { %209 = vmatpush.msra.mxu2 %v81_v17  ;;  %106 = vmatpush.msra.mxu0 %v81_v17 }
  0x24   :  { %224 = vmatpush.msra.mxu3 %v129_v22  ;;  %148 = vmatpush.msra.mxu1 %v129_v22 }
  0x25   :  { %210 = vmatpush.msra.mxu2 %v80_v19  ;;  %107 = vmatpush.msra.mxu0 %v80_v19 }
  0x26   :  { %225 = vmatpush.msra.mxu3 %v128_v24  ;;  %149 = vmatpush.msra.mxu1 %v128_v24 }
  0x27   :  { %211 = vmatpush.msra.mxu2 %v79_v21  ;;  %108 = vmatpush.msra.mxu0 %v79_v21 }
  0x28   :  { %226 = vmatpush.msra.mxu3 %v127_v26  ;;  %150 = vmatpush.msra.mxu1 %v127_v26 }
  0x29   :  { %212 = vmatpush.msra.mxu2 %v78_v23  ;;  %109 = vmatpush.msra.mxu0 %v78_v23 }
  0x2a   :  { %227 = vmatpush.msra.mxu3 %v126_v30  ;;  %151 = vmatpush.msra.mxu1 %v126_v30 }
  0x2b   :  { %213 = vmatpush.msra.mxu2 %v77_v25  ;;  %110 = vmatpush.msra.mxu0 %v77_v25 }
  0x2c   :  { %228 = vmatpush.msra.mxu3 %v125_v31  ;;  %152 = vmatpush.msra.mxu1 %v125_v31 }
  0x2d   :  { %214 = vmatpush.msra.mxu2 %v76_v27  ;;  %111 = vmatpush.msra.mxu0 %v76_v27 }
  0x2e   :  { %115 = vmatmul.f32.vlgmr.msra.gmra.mxu2 %v75_v28  ;;  %112 = vmatmul.f32.vlgmr.msra.gmra.mxu0 %v74_v29 }
  0x2f   :  { %229 = vmatpush.msra.mxu3 %v124_v32  ;;  %153 = vmatpush.msra.mxu1 %v124_v32 }
  0x31   :  { %230 = vmatpush.msra.mxu3 %v123_v33  ;;  %154 = vmatpush.msra.mxu1 %v123_v33 }
  0xab   :  { %v113_v35 = vpop.f32.mrf.mxu0 }
  0xac   :  { %v114_v36 = vadd.f32 %v237_v34, %v113_v35 }
  0xae   :  { %v119_v37 = vmax.f32 %v114_v36, 0.0 }
  0xb0   :  { %155 = vmatmul.f32.vlgmr.msra.gmra.mxu1 %v119_v37 }
  0xb1   :  { %v116_v38 = vpop.f32.mrf.mxu2 }
  0xb2   :  { %v117_v39 = vadd.f32 %v237_v34, %v116_v38 }
  0xb4   :  { %v120_v40 = vmax.f32 %v117_v39, 0.0 }
  0xb6   :  { %158 = vmatmul.f32.vlgmr.msra.gmra.mxu3 %v120_v40 }
 0x12d   :  { %v156_v42 = vpop.f32.mrf.mxu1 }
 0x12e   :  { %v175_v43 = vadd.f32 %v238_v41, %v156_v42 }
 0x130   :  { %177 = vst [vmem:[#allocation9] sm:$0xff] %v175_v43 }
 0x139   :  { %v159_v44 = vpop.f32.mrf.mxu3 }
 0x13a   :  { %v176_v45 = vadd.f32 %v238_v41, %v159_v44 }
 0x13c   :  { %178 = vst [vmem:[#allocation9 + $0x8] sm:$0xff] %v176_v45 }
 0x13d   :  { %191 = dma.vmem_to_hbm [thread:$0]  %s184_s12, 256, %s186_s2, [#allocation5], %s342_s26, %s342_s26, %s343_s27  }
 0x13e   :  { %339 = dma.done.wait [#allocation5], 256  }
 0x13f   :  { %340 = vsyncadd [#allocation5], 4294967040 }
 0x140   :  { %196 = vsyncpa [#allocation4], 1 }
 0x141   :  { %197 = vsyncpa [#allocation7], 1 }
 0x142   :  { %198 = vsyncpa [#allocation5], 1 }

</bundles_post_ra>
